<compile_context>
chip_gen: v5e
topology: v5e:2x2
jax: 0.10.0
libtpu: 0.0.40
codegen_flags: <defaults>
</compile_context>

<pallas_src>
import math
from functools import partial

import jax
import jax.numpy as jnp
from jax.experimental import pallas as pl
from jax.experimental.pallas import tpu as pltpu


def _rmsnorm_kernel(x_ref, w_ref, o_ref, *, eps, valid_dim, denom):
    """One tile of rows: sum-of-squares reduction + scale, all in-kernel."""
    x = x_ref[...].astype(jnp.float32)              # x.float()
    h = x.shape[-1]
    # Masked sum of squares over the valid (non-dummy-head) prefix. valid_dim
    # is a static Python int and a multiple of 128, so this is a free,
    # tile-boundary-aligned slice (no iota / compare / select).
    xs = x[:, :valid_dim] if valid_dim < h else x
    var = jnp.sum(xs * xs, axis=-1, keepdims=True) * jnp.float32(1.0 / denom)
    inv = jax.lax.rsqrt(var + jnp.float32(eps))
    # torch: output = (x.float() * rsqrt).type_as(x); output = output * weight
    y = (x * inv).astype(x_ref.dtype)               # rounding point of .type_as(x)
    w = w_ref[...].astype(jnp.float32)
    o_ref[...] = (y.astype(jnp.float32) * w).astype(o_ref.dtype)


def _choose_tile_rows(rows, hidden, in_itemsize, out_itemsize):
    """Largest multiple-of-8 row tile fitting a conservative VMEM budget."""
    # Per grid step: double-buffered input tile + double-buffered output tile.
    budget_bytes = 12 * 1024 * 1024
    per_row_bytes = 2 * hidden * (in_itemsize + out_itemsize)
    t = max(8, (budget_bytes // max(per_row_bytes, 1)) // 8 * 8)
    t = min(t, 1024)
    # No need for a tile wider than the (8-rounded) row count.
    t = min(t, max(8, -(-rows // 8) * 8))
    return int(t)


def _run_rmsnorm_2d(x2d, weight, *, eps, valid_dim, denom):
    rows, hidden = x2d.shape
    out_dtype = jnp.promote_types(x2d.dtype, weight.dtype)
    in_isz = jnp.dtype(x2d.dtype).itemsize
    out_isz = jnp.dtype(out_dtype).itemsize
    w_isz = jnp.dtype(weight.dtype).itemsize

    tile_rows = _choose_tile_rows(rows, hidden, in_isz, out_isz)
    grid = (pl.cdiv(rows, tile_rows),)

    kernel = partial(_rmsnorm_kernel, eps=eps, valid_dim=valid_dim, denom=denom)
    cost = pl.CostEstimate(
        flops=3 * rows * hidden,
        transcendentals=rows,
        bytes_accessed=rows * hidden * (in_isz + out_isz) + hidden * w_isz,
    )
    return pl.pallas_call(
        kernel,
        out_shape=jax.ShapeDtypeStruct((rows, hidden), out_dtype),
        grid=grid,
        in_specs=[
            pl.BlockSpec((tile_rows, hidden), lambda i: (i, 0)),
            pl.BlockSpec((1, hidden), lambda i: (0, 0)),
        ],
        out_specs=pl.BlockSpec((tile_rows, hidden), lambda i: (i, 0)),
        compiler_params=pltpu.CompilerParams(
            dimension_semantics=("parallel",),
        ),
        cost_estimate=cost,
    )(x2d, weight.reshape(1, hidden))


def intern_vit_rmsnorm(x, weight, *, eps=1e-6, compute_var=False,
                       unpadded_hidden_size=None):
    """JAX wrapper mirroring InternViTRMSNorm.forward (world_size == 1)."""
    if not compute_var:
        hidden = x.shape[-1]
        rows = math.prod(x.shape[:-1])
        out2d = _run_rmsnorm_2d(
            x.reshape(rows, hidden), weight,
            eps=eps, valid_dim=hidden, denom=float(hidden))
        return out2d.reshape(x.shape[:-1] + (hidden,))

    # compute_var path: x is (s, b, total_heads, max_dim)
    s, b = x.shape[0], x.shape[1]
    max_dim = x.shape[-1]
    x3 = x.reshape(s, b, -1)
    total_heads = x3.shape[-1] // max_dim
    if max_dim == 128:
        valid_heads = 25
    elif max_dim == 64:
        valid_heads = 16
    else:
        raise ValueError("Cannot infer number of heads.")
    # world_size == 1 => all valid heads live on this (only) rank.
    valid_heads_rank0 = min(valid_heads, total_heads)
    valid_dim = max_dim * valid_heads_rank0
    hidden = x3.shape[-1]
    rows = s * b
    out2d = _run_rmsnorm_2d(
        x3.reshape(rows, hidden), weight,
        eps=eps, valid_dim=valid_dim, denom=float(unpadded_hidden_size))
    return out2d.reshape(s, b, total_heads, max_dim)


def _reference(x, weight, *, eps, compute_var, unpadded_hidden_size=None):
    """Pure-JAX reference matching the PyTorch forward (world_size=1)."""
    xf = x.astype(jnp.float32)
    if not compute_var:
        var = jnp.mean(xf * xf, axis=-1, keepdims=True)
        y = (xf * jax.lax.rsqrt(var + eps)).astype(x.dtype) * weight
        return y
    s, b = x.shape[0], x.shape[1]
    max_dim = x.shape[-1]
    x3 = xf.reshape(s, b, -1)
    total_heads = x3.shape[-1] // max_dim
    valid_heads = 25 if max_dim == 128 else 16
    valid_dim = max_dim * min(valid_heads, total_heads)
    var = jnp.sum(x3[..., :valid_dim] ** 2, axis=-1, keepdims=True) / unpadded_hidden_size
    y = (x3 * jax.lax.rsqrt(var + eps)).astype(x.dtype) * weight
    return y.reshape(s, b, total_heads, max_dim)


if __name__ == "__main__":
    key = jax.random.PRNGKey(0)
    k1, k2, k3 = jax.random.split(key, 3)

    # --- case 1: standard RMSNorm (compute_var=False), hidden_size=32 ---
    seq, batch, hidden = 2, 8, 32
    x = jax.random.normal(k1, (seq, batch, hidden), dtype=jnp.float32)
    weight = jnp.ones((hidden,), dtype=jnp.float32)          # torch.ones(hidden_size)
    out = intern_vit_rmsnorm(x, weight, eps=1e-6, compute_var=False)
    jax.block_until_ready(out)
    ref = _reference(x, weight, eps=1e-6, compute_var=False)
    assert out.shape == x.shape and out.dtype == x.dtype
    assert jnp.allclose(out, ref, atol=1e-5, rtol=1e-5)

    # --- case 2: compute_var=True (q/k-norm style), max_dim=64, 16 heads ---
    s, b, heads, max_dim = 2, 4, 16, 64
    unpadded_hidden = heads * max_dim                        # config.hidden_size
    xv = jax.random.normal(k2, (s, b, heads, max_dim), dtype=jnp.float32)
    weight_v = jnp.ones((heads * max_dim,), dtype=jnp.float32)
    out_v = intern_vit_rmsnorm(xv, weight_v, eps=1e-6, compute_var=True,
                               unpadded_hidden_size=unpadded_hidden)
    jax.block_until_ready(out_v)
    ref_v = _reference(xv, weight_v, eps=1e-6, compute_var=True,
                       unpadded_hidden_size=unpadded_hidden)
    assert out_v.shape == xv.shape and out_v.dtype == xv.dtype
    assert jnp.allclose(out_v, ref_v, atol=1e-5, rtol=1e-5)

    # --- case 3: ragged row count (not a multiple of the tile) still works ---
    x3 = jax.random.normal(k3, (3, 7, 32), dtype=jnp.float32)
    out3 = intern_vit_rmsnorm(x3, weight, eps=1e-6, compute_var=False)
    jax.block_until_ready(out3)
    ref3 = _reference(x3, weight, eps=1e-6, compute_var=False)
    assert out3.shape == x3.shape
    assert jnp.allclose(out3, ref3, atol=1e-5, rtol=1e-5)

    print("KERNEL_OK")
</pallas_src>

<mosaic_0001>
module attributes {stable_mosaic.version = 11 : i64} {
  func.func @_rmsnorm_kernel(%arg0: i32, %arg1: memref<16x32xf32, #tpu.memory_space<vmem>>, %arg2: memref<1x32xf32, #tpu.memory_space<vmem>>, %arg3: memref<16x32xf32, #tpu.memory_space<vmem>>) attributes {dimension_semantics = [#tpu.dimension_semantics<parallel>], iteration_bounds = array<i64: 1>, scalar_prefetch = 0 : i64, scratch_operands = 0 : i64, tpu.core_type = #tpu.core_type<tc>, window_params = [{transform_indices = @transform_0, window_bounds = array<i64: 16, 32>}, {pipeline_mode = #tpu.pipeline_mode<synchronous>, transform_indices = @transform_1, window_bounds = array<i64: 1, 32>}, {transform_indices = @transform_2, window_bounds = array<i64: 16, 32>}]} {
    %c0 = arith.constant 0 : index
    %c0_0 = arith.constant 0 : index
    %0 = vector.load %arg1[%c0, %c0_0] : memref<16x32xf32, #tpu.memory_space<vmem>>, vector<16x32xf32>
    %1 = arith.mulf %0, %0 : vector<16x32xf32>
    %cst = arith.constant dense<0.000000e+00> : vector<16xf32>
    %2 = vector.multi_reduction <add>, %1, %cst [1] : vector<16x32xf32> to vector<16xf32>
    %3 = vector.shape_cast %2 : vector<16xf32> to vector<16x1xf32>
    %cst_1 = arith.constant 3.125000e-02 : f32
    %4 = vector.broadcast %cst_1 : f32 to vector<16x1xf32>
    %5 = arith.mulf %3, %4 : vector<16x1xf32>
    %cst_2 = arith.constant 9.99999997E-7 : f32
    %6 = vector.broadcast %cst_2 : f32 to vector<16x1xf32>
    %7 = arith.addf %5, %6 : vector<16x1xf32>
    %8 = math.rsqrt %7 : vector<16x1xf32>
    %9 = vector.broadcast %8 : vector<16x1xf32> to vector<16x32xf32>
    %10 = arith.mulf %0, %9 : vector<16x32xf32>
    %c0_3 = arith.constant 0 : index
    %c0_4 = arith.constant 0 : index
    %11 = vector.load %arg2[%c0_3, %c0_4] : memref<1x32xf32, #tpu.memory_space<vmem>>, vector<1x32xf32>
    %12 = vector.broadcast %11 : vector<1x32xf32> to vector<16x32xf32>
    %13 = arith.mulf %10, %12 : vector<16x32xf32>
    %c0_5 = arith.constant 0 : index
    %c0_6 = arith.constant 0 : index
    %14 = vector.load %arg3[%c0_5, %c0_6] : memref<16x32xf32, #tpu.memory_space<vmem>>, vector<16x32xf32>
    tpu.vector_store %arg3[%c0_5, %c0_6], %13 {strides = array<i32>} : memref<16x32xf32, #tpu.memory_space<vmem>>, vector<16x32xf32>,
    return
  }
  func.func @transform_0(%arg0: i32) -> (i32, i32) {
    %c0_i32 = arith.constant 0 : i32
    %c0_i32_0 = arith.constant 0 : i32
    return %arg0, %c0_i32 : i32, i32
  }
  func.func @transform_1(%arg0: i32) -> (i32, i32) {
    %c0_i32 = arith.constant 0 : i32
    %c0_i32_0 = arith.constant 0 : i32
    %c0_i32_1 = arith.constant 0 : i32
    return %c0_i32, %c0_i32_0 : i32, i32
  }
  func.func @transform_2(%arg0: i32) -> (i32, i32) {
    %c0_i32 = arith.constant 0 : i32
    %c0_i32_0 = arith.constant 0 : i32
    return %arg0, %c0_i32 : i32, i32
  }
}

</mosaic_0001>

<bundles_post_ra>
// kernel: tpu_custom_call.1
= control target key start
LH: loop header
LB: loop body
LE: loop exit
PB: predicated region body
PF: predicated region fallthrough
CT: control target
= control target key end

     0   :  { %7 = vsyncpa [#allocation3], 0  ;;  %s234_s0 = inlined_call_operand.hbm [shape: f32[16,32], index: 0, kind: input, shape index: {}]   ;;  %s235_s1 = inlined_call_operand.hbm [shape: f32[1,32], index: 1, kind: input, shape index: {}]   ;;  %s236_s2 = inlined_call_operand.hbm [shape: f32[16,32], index: 2, kind: output, shape index: {}]  }
   0x1   :  { %8 = vsyncpa [#allocation6], 0 }
   0x2   :  { %9 = vsyncpa [#allocation4], 0  ;;  %s14_s11 = sshll.u32 %s234_s0, 4  ;;  %s195_s12 = smov [#allocation2]   ;;  %s15_s11 = int_to_ptr.hbm [resolvable:$true] %s14_s11 }
   0x3   :  { %s16_s13 = sshll.u32 %s195_s12, 4  ;;  %s28_s16 = sshll.u32 %s235_s1, 4  ;;  %s17_s13 = int_to_ptr.vmem [resolvable:$true] %s16_s13  ;;  %s29_s16 = int_to_ptr.hbm [resolvable:$true] %s28_s16 }
   0x4   :  { %s196_s17 = smov 128   ;;  %s197_s18 = smov 8  }
   0x5   :  { %22 = dma.hbm_to_vmem [thread:$0]  %s15_s11, 256, %s17_s13, [#allocation3], %s196_s17, %s196_s17, %s197_s18  }
   0x6   :  { %s198_s19 = smov [#allocation5]  }
   0x7   :  { %s30_s20 = sshll.u32 %s198_s19, 4  ;;  %s31_s20 = int_to_ptr.vmem [resolvable:$true] %s30_s20 }
   0x8   :  { %33 = dma.hbm_to_vmem [thread:$0]  %s29_s16, 16, %s31_s20, [#allocation6]  }
   0x9   :  { %189 = dma.done.wait [#allocation3], 256  }
   0xa   :  { %190 = vsyncadd [#allocation3], 4294967040 }
   0xb   :  { %191 = dma.done.wait [#allocation6], 16  }
   0xc   :  { %192 = vsyncadd [#allocation6], 4294967280  ;;  %v42_v0 = vld [vmem:[#allocation2] sm:$0xff]  ;;  %vm46_vm0 = vcmask 261120   ;;  %v43_v2 = vld [vmem:[#allocation2 + $0x8] sm:$0xff]  ;;  %s199_s0 = smov [#allocation7]  }
   0xd   :  { %v44_v1 = vmul.f32 %v42_v0, %v42_v0  ;;  %v45_v4 = vmul.f32 %v43_v2, %v43_v2  ;;  %v112_v20 = vld [vmem:[#allocation5] ss:$0 sm:$0xff]  ;;  %s91_s1 = sshll.u32 %s199_s0, 4  ;;  %s93_s23 = sshll.u32 %s236_s2, 4  ;;  %s92_s1 = int_to_ptr.vmem [resolvable:$true] %s91_s1  ;;  %s94_s23 = int_to_ptr.hbm [resolvable:$true] %s93_s23 }
   0xf   :  { %v47_v3 = vsel %vm46_vm0, %v44_v1, 0.0  ;;  %v50_v5 = vsel %vm46_vm0, %v45_v4, 0.0 }
  0x10   :  { %48 = vadd.xlane.f32.xlu0 %v47_v3 }
  0x18   :  { %51 = vadd.xlane.f32.xlu0 %v50_v5 }
  0x83   :  { %v49_v6 = vpop.xlane.xlu0 %48 }
  0x84   :  { %v53_v7 = vmul.f32 0.03125, %v49_v6 }
  0x86   :  { %v55_v8 = vadd.f32 1e-06, %v53_v7 }
  0x88   :  { %113 = vrsqrt.f32 %v55_v8  ;;  %vm63_vm2 = vweird.f32 %v55_v8 }
  0x8b   :  { %v52_v9 = vpop.xlane.xlu0 %51 }
  0x8c   :  { %v54_v10 = vmul.f32 0.03125, %v52_v9 }
  0x8e   :  { %v114_v11 = vpop.eup %113  ;;  %v56_v12 = vadd.f32 1e-06, %v54_v10 }
  0x8f   :  { %v58_v13 = vmul.f32 %v114_v11, %v55_v8  ;;  %vm64_vm1 = vweird.f32 %v114_v11 }
  0x90   :  { %115 = vrsqrt.f32 %v56_v12  ;;  %vm65_vm3 = vmor %vm63_vm2, %vm64_vm1  ;;  %vm73_vm5 = vweird.f32 %v56_v12 }
  0x91   :  { %v59_v14 = vmul.f32 %v114_v11, %v58_v13 }
  0x93   :  { %v60_v15 = vmul.f32 0.5, %v59_v14 }
  0x95   :  { %v61_v16 = vsub.f32 1.5, %v60_v15 }
  0x96   :  { %v116_v17 = vpop.eup %115 }
  0x97   :  { %v62_v18 = vmul.f32 %v114_v11, %v61_v16  ;;  %v68_v19 = vmul.f32 %v116_v17, %v56_v12  ;;  %vm74_vm4 = vweird.f32 %v116_v17 }
  0x98   :  { %vm75_vm6 = vmor %vm73_vm5, %vm74_vm4 }
  0x99   :  { %v66_v21 = vsel %vm65_vm3, %v114_v11, %v62_v18  ;;  %v69_v22 = vmul.f32 %v116_v17, %v68_v19 }
  0x9a   :  { %v77_v23 = vmul.f32 %v66_v21, %v42_v0 }
  0x9b   :  { %v70_v24 = vmul.f32 0.5, %v69_v22 }
  0x9c   :  { %v83_v25 = vmul.f32 %v112_v20, %v77_v23 }
  0x9d   :  { %v71_v26 = vsub.f32 1.5, %v70_v24 }
  0x9e   :  { %85 = vst.msk [vmem:[#allocation7] sm:$0xff] %vm46_vm0, %v83_v25 }
  0x9f   :  { %v72_v27 = vmul.f32 %v116_v17, %v71_v26 }
  0xa1   :  { %v76_v28 = vsel %vm75_vm6, %v116_v17, %v72_v27 }
  0xa2   :  { %v78_v29 = vmul.f32 %v76_v28, %v43_v2 }
  0xa4   :  { %v84_v30 = vmul.f32 %v112_v20, %v78_v29 }
  0xa6   :  { %86 = vst.msk [vmem:[#allocation7 + $0x8] sm:$0xff] %vm46_vm0, %v84_v30 }
  0xa7   :  { %99 = dma.vmem_to_hbm [thread:$0]  %s92_s1, 256, %s94_s23, [#allocation4], %s196_s17, %s196_s17, %s197_s18  }
  0xa8   :  { %193 = dma.done.wait [#allocation4], 256  }
  0xa9   :  { %194 = vsyncadd [#allocation4], 4294967040 }
  0xaa   :  { %104 = vsyncpa [#allocation3], 1 }
  0xab   :  { %105 = vsyncpa [#allocation6], 1 }
  0xac   :  { %106 = vsyncpa [#allocation4], 1 }

</bundles_post_ra>
